<compile_context>
chip_gen: v6e
topology: v6e:2x2x1
jax: 0.10.0
libtpu: 0.0.40
codegen_flags: <defaults>
</compile_context>

<pallas_src>
import functools

import jax
import jax.numpy as jnp
import numpy as np
from jax.experimental import pallas as pl
from jax.experimental.pallas import tpu as pltpu

EPS = 1e-5

# 3x3 taps in (dh, dw) order; must match the conv2 weight reshape in the wrapper.
_TAPS = tuple((dh, dw) for dh in (-1, 0, 1) for dw in (-1, 0, 1))
_CENTER_TAP = _TAPS.index((0, 0))


def _bottleneck_kernel(x_ref, w1t_ref, g1_ref, b1_ref, w2m_ref, g2_ref, b2_ref,
                       w3t_ref, g3_ref, b3_ref, mask_ref, o_ref, *,
                       w_img, m_true, compute_dtype):
    """Single-call Bottleneck forward on a (C, Mp) lane-dense slab."""
    mp = x_ref.shape[1]
    inv_m = jnp.float32(1.0 / m_true)

    def mm(w, act):
        # Weights are pre-cast to compute_dtype in the wrapper; only the
        # activation is cast by the caller.  Accumulation is always f32.
        return jnp.dot(w, act, preferred_element_type=jnp.float32)

    def bn_train(raw, g_ref, b_ref):
        # Fused single-pass biased batch statistics over lanes (N,H,W).
        # TODO(synk): switch to a shifted two-pass / Welford merge in the tiled
        # production variant (E[x^2]-E[x]^2 cancellation at large M).
        s = jnp.sum(raw, axis=1, keepdims=True)
        ss = jnp.sum(raw * raw, axis=1, keepdims=True)
        mean = s * inv_m
        var = jnp.maximum(ss * inv_m - mean * mean, 0.0)
        scale = jax.lax.rsqrt(var + EPS) * g_ref[...]
        return (raw - mean) * scale + b_ref[...]

    # (1, Mp) pad-lane validity (== center tap mask), cast to f32 for the h2
    # multiply below (single row, negligible).
    valid = mask_ref[_CENTER_TAP].astype(jnp.float32)

    # ---- conv1 (1x1) -> bn1 -> relu ----
    h1 = mm(w1t_ref[...], x_ref[...].astype(compute_dtype))      # (width_p, Mp) f32
    # NOTE: no `* valid` here — every conv2 tap below is multiplied by a mask
    # that already includes pad-lane validity, so masking h1 would be dead work.
    h1 = jnp.maximum(bn_train(h1, g1_ref, b1_ref), 0.0)

    # ---- conv2 (3x3, stride 1, pad 1): in-register im2col + ONE matmul ----
    # Cast ONCE before the 9x replication so the rolls / mask multiplies /
    # concat all run in compute_dtype (masks are already compute_dtype).
    h1c = h1.astype(compute_dtype)
    cols = []
    for t, (dh, dw) in enumerate(_TAPS):
        shift = (-(dh * w_img + dw)) % mp
        # Static lane rotation rides the XLU slot (VALU/vld stay free).  Any
        # lane that wrapped across an image/pad boundary is zeroed by the mask.
        shifted = h1c if shift == 0 else pltpu.roll(h1c, shift, axis=1)
        cols.append(shifted * mask_ref[t])
    xcol = jnp.concatenate(cols, axis=0)       # (9*width_p, Mp), compute_dtype
    h2 = mm(w2m_ref[...], xcol)                # contraction dim = 9*width_p
    # This `* valid` IS load-bearing: BN3's m_true-normalized sums require the
    # pad lanes of conv3's raw output (hence of h2) to be exactly zero.
    h2 = jnp.maximum(bn_train(h2, g2_ref, b2_ref), 0.0) * valid

    # ---- conv3 (1x1) -> bn3 ----
    h3 = bn_train(mm(w3t_ref[...], h2.astype(compute_dtype)), g3_ref, b3_ref)

    # ---- residual add (downsample is None -> identity) + relu ----
    # Re-read x right before the add to keep its live range short.
    o_ref[...] = jnp.maximum(h3 + x_ref[...].astype(jnp.float32),
                             0.0).astype(o_ref.dtype)


def _pad_axis(a, axis, size):
    if a.shape[axis] == size:
        return a
    pads = [(0, 0)] * a.ndim
    pads[axis] = (0, size - a.shape[axis])
    return jnp.pad(a, pads)


def bottleneck_forward(x_nchw, params, compute_dtype=jnp.float32):
    """Bottleneck.forward (stride=1, groups=1, dilation=1, downsample=None).

    params = (w1, g1, b1, w2, g2, b2, w3, g3, b3) with
      w1: (Cin, width)         conv1 1x1 weight as (in, out)
      w2: (3, 3, width, width) conv2 3x3 weight, HWIO
      w3: (width, Cout)        conv3 1x1 weight as (in, out)
      g*, b*: (1, C)           BatchNorm2d affine parameters.

    compute_dtype controls the MXU operand dtype only (accumulation and all
    BN / elementwise math stay f32).  bfloat16 gives full-rate MXU on every
    generation, including v5e (whose MXU is bf16-native); validate against the
    required tolerance before enabling — the shipped test keeps f32.
    """
    w1, g1, b1, w2, g2, b2, w3, g3, b3 = params
    n, cin, h_img, w_img = x_nchw.shape
    width = w1.shape[1]
    cout = w3.shape[1]
    assert cin == cout, "identity residual needs inplanes == planes * expansion"

    m = n * h_img * w_img
    mp = ((m + 127) // 128) * 128                # lane-dense spatial axis
    # bf16 packs two rows per sublane -> keep contraction rows 16-aligned then.
    sub = 16 if jnp.dtype(compute_dtype) == jnp.dtype(jnp.bfloat16) else 8
    width_p = ((width + sub - 1) // sub) * sub   # sublane-tile aligned width

    # NCHW -> (C, N*H*W).  TODO(synk): keep this slab layout across consecutive
    # bottleneck blocks (these transposes are separate XLA HBM round trips that
    # dominate wall-clock at toy shapes).
    x_t = _pad_axis(jnp.transpose(x_nchw, (1, 0, 2, 3)).reshape(cin, m), 1, mp)

    # Static MXU operands pre-cast to compute_dtype in the wrapper (no per-call
    # in-kernel casts; halves their DMA bytes / VMEM residency for bf16).
    w1t = _pad_axis(jnp.transpose(w1), 0, width_p).astype(compute_dtype)       # (width_p, Cin)
    w2p = _pad_axis(_pad_axis(w2, 2, width_p), 3, width_p)                     # (3,3,width_p,width_p)
    w2m = jnp.transpose(w2p.reshape(9 * width_p, width_p)).astype(compute_dtype)  # (width_p, 9*width_p)
    w3t = _pad_axis(jnp.transpose(w3), 1, width_p).astype(compute_dtype)       # (Cout, width_p)
    # BN affine parameters stay f32 (all BN / elementwise math is f32).
    g1c = _pad_axis(g1.reshape(width, 1), 0, width_p)
    b1c = _pad_axis(b1.reshape(width, 1), 0, width_p)
    g2c = _pad_axis(g2.reshape(width, 1), 0, width_p)
    b2c = _pad_axis(b2.reshape(width, 1), 0, width_p)
    g3c = g3.reshape(cout, 1)
    b3c = b3.reshape(cout, 1)

    # Precomputed {0,1} masks per 3x3 tap (center tap == pad-lane validity), so
    # the kernel needs no in-kernel iota / integer div-mod.  Kept in
    # compute_dtype so the tap multiplies stay in the matmul input dtype.
    # TODO(synk): at production spatial sizes, mask only boundary rows/cols (or
    # pre-bake a halo'd layout) so ~93% interior pixels skip the multiply.
    lane = np.arange(mp)
    hh = (lane // w_img) % h_img
    ww = lane % w_img
    real = lane < m
    masks = np.stack(
        [(real & (hh + dh >= 0) & (hh + dh < h_img)
               & (ww + dw >= 0) & (ww + dw < w_img)).astype(np.float32)
         for dh, dw in _TAPS], axis=0).reshape(9, 1, mp)
    tapmask = jnp.asarray(masks).astype(compute_dtype)

    kernel = functools.partial(_bottleneck_kernel, w_img=w_img, m_true=m,
                               compute_dtype=compute_dtype)
    vmem = pl.BlockSpec(memory_space=pltpu.MemorySpace.VMEM)
    itm = jnp.dtype(compute_dtype).itemsize
    flops = 2 * m * (cin * width + 9 * width * width + width * cout)
    bytes_accessed = (4 * 2 * cout * mp + itm * 9 * mp
                      + itm * (w1t.size + w2m.size + w3t.size)
                      + 4 * (4 * width_p + 2 * cout))

    out_t = pl.pallas_call(
        kernel,
        out_shape=jax.ShapeDtypeStruct((cout, mp), x_nchw.dtype),
        in_specs=[vmem] * 11,
        out_specs=vmem,
        compiler_params=pltpu.CompilerParams(
            # Ample for these shapes; re-derive per tile budget for production
            # sizes (notably v7x's 64 MiB physical / 32 MiB scoped VMEM).
            vmem_limit_bytes=16 * 1024 * 1024),
        cost_estimate=pl.CostEstimate(flops=flops,
                                      transcendentals=2 * width_p + cout,
                                      bytes_accessed=bytes_accessed),
    )(x_t, w1t, g1c, b1c, w2m, g2c, b2c, w3t, g3c, b3c, tapmask)

    out = out_t[:, :m].reshape(cout, n, h_img, w_img)
    return jnp.transpose(out, (1, 0, 2, 3))   # back to NCHW


def bottleneck_reference(x_nchw, params):
    # Pure-JAX reference (lax conv) used for correctness verification.
    (w1, g1, b1, w2, g2, b2, w3, g3, b3) = params
    x = jnp.transpose(x_nchw, (0, 2, 3, 1))
    dn = ('NHWC', 'HWIO', 'NHWC')

    def bn(h, g, b):
        mean = jnp.mean(h, axis=(0, 1, 2), keepdims=True)
        var = jnp.mean((h - mean) ** 2, axis=(0, 1, 2), keepdims=True)
        return (h - mean) * jax.lax.rsqrt(var + EPS) * g + b

    h = jax.lax.conv_general_dilated(x, w1[None, None], (1, 1), 'VALID',
                                     dimension_numbers=dn)
    h = jnp.maximum(bn(h, g1, b1), 0.0)
    h = jax.lax.conv_general_dilated(h, w2, (1, 1), ((1, 1), (1, 1)),
                                     dimension_numbers=dn)
    h = jnp.maximum(bn(h, g2, b2), 0.0)
    h = jax.lax.conv_general_dilated(h, w3[None, None], (1, 1), 'VALID',
                                     dimension_numbers=dn)
    h = bn(h, g3, b3)
    out = jnp.maximum(h + x, 0.0)
    return jnp.transpose(out, (0, 3, 1, 2))


if __name__ == "__main__":
    # Module config: inplanes=16, planes=4 -> width=4, out channels=16 (=inplanes).
    # 7x7 spatial gives m=98 < mp=128, so pad-lane handling is exercised too.
    N, inplanes, Hs, Ws = 2, 16, 7, 7
    planes = 4
    width = planes           # int(planes * 64/64) * 1
    cout = planes * 4        # expansion = 4

    key = jax.random.PRNGKey(0)
    ks = jax.random.split(key, 10)
    w1 = 0.1 * jax.random.normal(ks[0], (inplanes, width), jnp.float32)     # conv1 (in,out)
    w2 = 0.1 * jax.random.normal(ks[1], (3, 3, width, width), jnp.float32)  # conv2 HWIO
    w3 = 0.1 * jax.random.normal(ks[2], (width, cout), jnp.float32)         # conv3 (in,out)
    g1 = 1.0 + 0.1 * jax.random.normal(ks[3], (1, width), jnp.float32)
    b1 = 0.1 * jax.random.normal(ks[4], (1, width), jnp.float32)
    g2 = 1.0 + 0.1 * jax.random.normal(ks[5], (1, width), jnp.float32)
    b2 = 0.1 * jax.random.normal(ks[6], (1, width), jnp.float32)
    g3 = 1.0 + 0.1 * jax.random.normal(ks[7], (1, cout), jnp.float32)
    b3 = 0.1 * jax.random.normal(ks[8], (1, cout), jnp.float32)
    x = jax.random.normal(ks[9], (N, inplanes, Hs, Ws), jnp.float32)        # NCHW like PyTorch

    params = (w1, g1, b1, w2, g2, b2, w3, g3, b3)

    y = jax.jit(bottleneck_forward)(x, params)
    jax.block_until_ready(y)

    y_ref = bottleneck_reference(x, params)
    assert y.shape == (N, cout, Hs, Ws)
    err = float(jnp.max(jnp.abs(y - y_ref)))
    assert jnp.allclose(y, y_ref, atol=2e-4, rtol=2e-4), err
    print("KERNEL_OK")
</pallas_src>

<mosaic_0001>
module attributes {stable_mosaic.version = 11 : i64} {
  func.func @_bottleneck_kernel(%arg0: memref<16x128xf32, #tpu.memory_space<vmem>>, %arg1: memref<8x16xf32, #tpu.memory_space<vmem>>, %arg2: memref<8x1xf32, #tpu.memory_space<vmem>>, %arg3: memref<8x1xf32, #tpu.memory_space<vmem>>, %arg4: memref<8x72xf32, #tpu.memory_space<vmem>>, %arg5: memref<8x1xf32, #tpu.memory_space<vmem>>, %arg6: memref<8x1xf32, #tpu.memory_space<vmem>>, %arg7: memref<16x8xf32, #tpu.memory_space<vmem>>, %arg8: memref<16x1xf32, #tpu.memory_space<vmem>>, %arg9: memref<16x1xf32, #tpu.memory_space<vmem>>, %arg10: memref<9x1x128xf32, #tpu.memory_space<vmem>>, %arg11: memref<16x128xf32, #tpu.memory_space<vmem>>) attributes {dimension_semantics = [], scalar_prefetch = 0 : i64, scratch_operands = 0 : i64, tpu.core_type = #tpu.core_type<tc>} {
    %c4 = arith.constant 4 : index
    %c0 = arith.constant 0 : index
    %c0_0 = arith.constant 0 : index
    %0 = vector.load %arg10[%c4, %c0, %c0_0] : memref<9x1x128xf32, #tpu.memory_space<vmem>>, vector<1x1x128xf32>
    %1 = vector.shape_cast %0 : vector<1x1x128xf32> to vector<1x128xf32>
    %c0_1 = arith.constant 0 : index
    %c0_2 = arith.constant 0 : index
    %2 = vector.load %arg1[%c0_1, %c0_2] : memref<8x16xf32, #tpu.memory_space<vmem>>, vector<8x16xf32>
    %c0_3 = arith.constant 0 : index
    %c0_4 = arith.constant 0 : index
    %3 = vector.load %arg0[%c0_3, %c0_4] : memref<16x128xf32, #tpu.memory_space<vmem>>, vector<16x128xf32>
    %cst = arith.constant dense<0.000000e+00> : vector<8x128xf32>
    %4 = tpu.matmul %2, %3, %cst {dimension_numbers = #tpu.dot_dimension_numbers<[1], [0], [0], [1], [0, 0, 1, 1], [], []>} : vector<8x16xf32>, vector<16x128xf32>, vector<8x128xf32> -> vector<8x128xf32>
    %cst_5 = arith.constant dense<0.000000e+00> : vector<8xf32>
    %5 = vector.multi_reduction <add>, %4, %cst_5 [1] : vector<8x128xf32> to vector<8xf32>
    %6 = vector.shape_cast %5 : vector<8xf32> to vector<8x1xf32>
    %7 = arith.mulf %4, %4 : vector<8x128xf32>
    %cst_6 = arith.constant dense<0.000000e+00> : vector<8xf32>
    %8 = vector.multi_reduction <add>, %7, %cst_6 [1] : vector<8x128xf32> to vector<8xf32>
    %9 = vector.shape_cast %8 : vector<8xf32> to vector<8x1xf32>
    %cst_7 = arith.constant 0.0102040814 : f32
    %10 = vector.broadcast %cst_7 : f32 to vector<8x1xf32>
    %11 = arith.mulf %6, %10 : vector<8x1xf32>
    %cst_8 = arith.constant 0.0102040814 : f32
    %12 = vector.broadcast %cst_8 : f32 to vector<8x1xf32>
    %13 = arith.mulf %9, %12 : vector<8x1xf32>
    %14 = arith.mulf %11, %11 : vector<8x1xf32>
    %15 = arith.subf %13, %14 : vector<8x1xf32>
    %cst_9 = arith.constant 0.000000e+00 : f32
    %16 = vector.broadcast %cst_9 : f32 to vector<8x1xf32>
    %17 = arith.maximumf %15, %16 : vector<8x1xf32>
    %cst_10 = arith.constant 9.99999974E-6 : f32
    %18 = vector.broadcast %cst_10 : f32 to vector<8x1xf32>
    %19 = arith.addf %17, %18 : vector<8x1xf32>
    %20 = math.rsqrt %19 : vector<8x1xf32>
    %c0_11 = arith.constant 0 : index
    %c0_12 = arith.constant 0 : index
    %21 = vector.load %arg2[%c0_11, %c0_12] : memref<8x1xf32, #tpu.memory_space<vmem>>, vector<8x1xf32>
    %22 = arith.mulf %20, %21 : vector<8x1xf32>
    %23 = vector.broadcast %11 : vector<8x1xf32> to vector<8x128xf32>
    %24 = arith.subf %4, %23 : vector<8x128xf32>
    %25 = vector.broadcast %22 : vector<8x1xf32> to vector<8x128xf32>
    %26 = arith.mulf %24, %25 : vector<8x128xf32>
    %c0_13 = arith.constant 0 : index
    %c0_14 = arith.constant 0 : index
    %27 = vector.load %arg3[%c0_13, %c0_14] : memref<8x1xf32, #tpu.memory_space<vmem>>, vector<8x1xf32>
    %28 = vector.broadcast %27 : vector<8x1xf32> to vector<8x128xf32>
    %29 = arith.addf %26, %28 : vector<8x128xf32>
    %cst_15 = arith.constant 0.000000e+00 : f32
    %30 = vector.broadcast %cst_15 : f32 to vector<8x128xf32>
    %31 = arith.maximumf %29, %30 : vector<8x128xf32>
    %c8_i32 = arith.constant 8 : i32
    %32 = tpu.dynamic_rotate %31 by %c8_i32 dim 1 : vector<8x128xf32>, i32 -> vector<8x128xf32>
    %c0_16 = arith.constant 0 : index
    %c0_17 = arith.constant 0 : index
    %c0_18 = arith.constant 0 : index
    %33 = vector.load %arg10[%c0_16, %c0_17, %c0_18] : memref<9x1x128xf32, #tpu.memory_space<vmem>>, vector<1x1x128xf32>
    %34 = vector.shape_cast %33 : vector<1x1x128xf32> to vector<1x128xf32>
    %35 = vector.broadcast %34 : vector<1x128xf32> to vector<8x128xf32>
    %36 = arith.mulf %32, %35 : vector<8x128xf32>
    %c7_i32 = arith.constant 7 : i32
    %37 = tpu.dynamic_rotate %31 by %c7_i32 dim 1 : vector<8x128xf32>, i32 -> vector<8x128xf32>
    %c1 = arith.constant 1 : index
    %c0_19 = arith.constant 0 : index
    %c0_20 = arith.constant 0 : index
    %38 = vector.load %arg10[%c1, %c0_19, %c0_20] : memref<9x1x128xf32, #tpu.memory_space<vmem>>, vector<1x1x128xf32>
    %39 = vector.shape_cast %38 : vector<1x1x128xf32> to vector<1x128xf32>
    %40 = vector.broadcast %39 : vector<1x128xf32> to vector<8x128xf32>
    %41 = arith.mulf %37, %40 : vector<8x128xf32>
    %c6_i32 = arith.constant 6 : i32
    %42 = tpu.dynamic_rotate %31 by %c6_i32 dim 1 : vector<8x128xf32>, i32 -> vector<8x128xf32>
    %c2 = arith.constant 2 : index
    %c0_21 = arith.constant 0 : index
    %c0_22 = arith.constant 0 : index
    %43 = vector.load %arg10[%c2, %c0_21, %c0_22] : memref<9x1x128xf32, #tpu.memory_space<vmem>>, vector<1x1x128xf32>
    %44 = vector.shape_cast %43 : vector<1x1x128xf32> to vector<1x128xf32>
    %45 = vector.broadcast %44 : vector<1x128xf32> to vector<8x128xf32>
    %46 = arith.mulf %42, %45 : vector<8x128xf32>
    %c1_i32 = arith.constant 1 : i32
    %47 = tpu.dynamic_rotate %31 by %c1_i32 dim 1 : vector<8x128xf32>, i32 -> vector<8x128xf32>
    %c3 = arith.constant 3 : index
    %c0_23 = arith.constant 0 : index
    %c0_24 = arith.constant 0 : index
    %48 = vector.load %arg10[%c3, %c0_23, %c0_24] : memref<9x1x128xf32, #tpu.memory_space<vmem>>, vector<1x1x128xf32>
    %49 = vector.shape_cast %48 : vector<1x1x128xf32> to vector<1x128xf32>
    %50 = vector.broadcast %49 : vector<1x128xf32> to vector<8x128xf32>
    %51 = arith.mulf %47, %50 : vector<8x128xf32>
    %c4_25 = arith.constant 4 : index
    %c0_26 = arith.constant 0 : index
    %c0_27 = arith.constant 0 : index
    %52 = vector.load %arg10[%c4_25, %c0_26, %c0_27] : memref<9x1x128xf32, #tpu.memory_space<vmem>>, vector<1x1x128xf32>
    %53 = vector.shape_cast %52 : vector<1x1x128xf32> to vector<1x128xf32>
    %54 = vector.broadcast %53 : vector<1x128xf32> to vector<8x128xf32>
    %55 = arith.mulf %31, %54 : vector<8x128xf32>
    %c127_i32 = arith.constant 127 : i32
    %56 = tpu.dynamic_rotate %31 by %c127_i32 dim 1 : vector<8x128xf32>, i32 -> vector<8x128xf32>
    %c5 = arith.constant 5 : index
    %c0_28 = arith.constant 0 : index
    %c0_29 = arith.constant 0 : index
    %57 = vector.load %arg10[%c5, %c0_28, %c0_29] : memref<9x1x128xf32, #tpu.memory_space<vmem>>, vector<1x1x128xf32>
    %58 = vector.shape_cast %57 : vector<1x1x128xf32> to vector<1x128xf32>
    %59 = vector.broadcast %58 : vector<1x128xf32> to vector<8x128xf32>
    %60 = arith.mulf %56, %59 : vector<8x128xf32>
    %c122_i32 = arith.constant 122 : i32
    %61 = tpu.dynamic_rotate %31 by %c122_i32 dim 1 : vector<8x128xf32>, i32 -> vector<8x128xf32>
    %c6 = arith.constant 6 : index
    %c0_30 = arith.constant 0 : index
    %c0_31 = arith.constant 0 : index
    %62 = vector.load %arg10[%c6, %c0_30, %c0_31] : memref<9x1x128xf32, #tpu.memory_space<vmem>>, vector<1x1x128xf32>
    %63 = vector.shape_cast %62 : vector<1x1x128xf32> to vector<1x128xf32>
    %64 = vector.broadcast %63 : vector<1x128xf32> to vector<8x128xf32>
    %65 = arith.mulf %61, %64 : vector<8x128xf32>
    %c121_i32 = arith.constant 121 : i32
    %66 = tpu.dynamic_rotate %31 by %c121_i32 dim 1 : vector<8x128xf32>, i32 -> vector<8x128xf32>
    %c7 = arith.constant 7 : index
    %c0_32 = arith.constant 0 : index
    %c0_33 = arith.constant 0 : index
    %67 = vector.load %arg10[%c7, %c0_32, %c0_33] : memref<9x1x128xf32, #tpu.memory_space<vmem>>, vector<1x1x128xf32>
    %68 = vector.shape_cast %67 : vector<1x1x128xf32> to vector<1x128xf32>
    %69 = vector.broadcast %68 : vector<1x128xf32> to vector<8x128xf32>
    %70 = arith.mulf %66, %69 : vector<8x128xf32>
    %c120_i32 = arith.constant 120 : i32
    %71 = tpu.dynamic_rotate %31 by %c120_i32 dim 1 : vector<8x128xf32>, i32 -> vector<8x128xf32>
    %c8 = arith.constant 8 : index
    %c0_34 = arith.constant 0 : index
    %c0_35 = arith.constant 0 : index
    %72 = vector.load %arg10[%c8, %c0_34, %c0_35] : memref<9x1x128xf32, #tpu.memory_space<vmem>>, vector<1x1x128xf32>
    %73 = vector.shape_cast %72 : vector<1x1x128xf32> to vector<1x128xf32>
    %74 = vector.broadcast %73 : vector<1x128xf32> to vector<8x128xf32>
    %75 = arith.mulf %71, %74 : vector<8x128xf32>
    %76 = tpu.concatenate %36, %41, %46, %51, %55, %60, %65, %70, %75 in 0 : vector<8x128xf32>, vector<8x128xf32>, vector<8x128xf32>, vector<8x128xf32>, vector<8x128xf32>, vector<8x128xf32>, vector<8x128xf32>, vector<8x128xf32>, vector<8x128xf32> -> vector<72x128xf32>
    %c0_36 = arith.constant 0 : index
    %c0_37 = arith.constant 0 : index
    %77 = vector.load %arg4[%c0_36, %c0_37] : memref<8x72xf32, #tpu.memory_space<vmem>>, vector<8x72xf32>
    %cst_38 = arith.constant dense<0.000000e+00> : vector<8x128xf32>
    %78 = tpu.matmul %77, %76, %cst_38 {dimension_numbers = #tpu.dot_dimension_numbers<[1], [0], [0], [1], [0, 0, 1, 1], [], []>} : vector<8x72xf32>, vector<72x128xf32>, vector<8x128xf32> -> vector<8x128xf32>
    %cst_39 = arith.constant dense<0.000000e+00> : vector<8xf32>
    %79 = vector.multi_reduction <add>, %78, %cst_39 [1] : vector<8x128xf32> to vector<8xf32>
    %80 = vector.shape_cast %79 : vector<8xf32> to vector<8x1xf32>
    %81 = arith.mulf %78, %78 : vector<8x128xf32>
    %cst_40 = arith.constant dense<0.000000e+00> : vector<8xf32>
    %82 = vector.multi_reduction <add>, %81, %cst_40 [1] : vector<8x128xf32> to vector<8xf32>
    %83 = vector.shape_cast %82 : vector<8xf32> to vector<8x1xf32>
    %cst_41 = arith.constant 0.0102040814 : f32
    %84 = vector.broadcast %cst_41 : f32 to vector<8x1xf32>
    %85 = arith.mulf %80, %84 : vector<8x1xf32>
    %cst_42 = arith.constant 0.0102040814 : f32
    %86 = vector.broadcast %cst_42 : f32 to vector<8x1xf32>
    %87 = arith.mulf %83, %86 : vector<8x1xf32>
    %88 = arith.mulf %85, %85 : vector<8x1xf32>
    %89 = arith.subf %87, %88 : vector<8x1xf32>
    %cst_43 = arith.constant 0.000000e+00 : f32
    %90 = vector.broadcast %cst_43 : f32 to vector<8x1xf32>
    %91 = arith.maximumf %89, %90 : vector<8x1xf32>
    %cst_44 = arith.constant 9.99999974E-6 : f32
    %92 = vector.broadcast %cst_44 : f32 to vector<8x1xf32>
    %93 = arith.addf %91, %92 : vector<8x1xf32>
    %94 = math.rsqrt %93 : vector<8x1xf32>
    %c0_45 = arith.constant 0 : index
    %c0_46 = arith.constant 0 : index
    %95 = vector.load %arg5[%c0_45, %c0_46] : memref<8x1xf32, #tpu.memory_space<vmem>>, vector<8x1xf32>
    %96 = arith.mulf %94, %95 : vector<8x1xf32>
    %97 = vector.broadcast %85 : vector<8x1xf32> to vector<8x128xf32>
    %98 = arith.subf %78, %97 : vector<8x128xf32>
    %99 = vector.broadcast %96 : vector<8x1xf32> to vector<8x128xf32>
    %100 = arith.mulf %98, %99 : vector<8x128xf32>
    %c0_47 = arith.constant 0 : index
    %c0_48 = arith.constant 0 : index
    %101 = vector.load %arg6[%c0_47, %c0_48] : memref<8x1xf32, #tpu.memory_space<vmem>>, vector<8x1xf32>
    %102 = vector.broadcast %101 : vector<8x1xf32> to vector<8x128xf32>
    %103 = arith.addf %100, %102 : vector<8x128xf32>
    %cst_49 = arith.constant 0.000000e+00 : f32
    %104 = vector.broadcast %cst_49 : f32 to vector<8x128xf32>
    %105 = arith.maximumf %103, %104 : vector<8x128xf32>
    %106 = vector.broadcast %1 : vector<1x128xf32> to vector<8x128xf32>
    %107 = arith.mulf %105, %106 : vector<8x128xf32>
    %c0_50 = arith.constant 0 : index
    %c0_51 = arith.constant 0 : index
    %108 = vector.load %arg7[%c0_50, %c0_51] : memref<16x8xf32, #tpu.memory_space<vmem>>, vector<16x8xf32>
    %cst_52 = arith.constant dense<0.000000e+00> : vector<16x128xf32>
    %109 = tpu.matmul %108, %107, %cst_52 {dimension_numbers = #tpu.dot_dimension_numbers<[1], [0], [0], [1], [0, 0, 1, 1], [], []>} : vector<16x8xf32>, vector<8x128xf32>, vector<16x128xf32> -> vector<16x128xf32>
    %cst_53 = arith.constant dense<0.000000e+00> : vector<16xf32>
    %110 = vector.multi_reduction <add>, %109, %cst_53 [1] : vector<16x128xf32> to vector<16xf32>
    %111 = vector.shape_cast %110 : vector<16xf32> to vector<16x1xf32>
    %112 = arith.mulf %109, %109 : vector<16x128xf32>
    %cst_54 = arith.constant dense<0.000000e+00> : vector<16xf32>
    %113 = vector.multi_reduction <add>, %112, %cst_54 [1] : vector<16x128xf32> to vector<16xf32>
    %114 = vector.shape_cast %113 : vector<16xf32> to vector<16x1xf32>
    %cst_55 = arith.constant 0.0102040814 : f32
    %115 = vector.broadcast %cst_55 : f32 to vector<16x1xf32>
    %116 = arith.mulf %111, %115 : vector<16x1xf32>
    %cst_56 = arith.constant 0.0102040814 : f32
    %117 = vector.broadcast %cst_56 : f32 to vector<16x1xf32>
    %118 = arith.mulf %114, %117 : vector<16x1xf32>
    %119 = arith.mulf %116, %116 : vector<16x1xf32>
    %120 = arith.subf %118, %119 : vector<16x1xf32>
    %cst_57 = arith.constant 0.000000e+00 : f32
    %121 = vector.broadcast %cst_57 : f32 to vector<16x1xf32>
    %122 = arith.maximumf %120, %121 : vector<16x1xf32>
    %cst_58 = arith.constant 9.99999974E-6 : f32
    %123 = vector.broadcast %cst_58 : f32 to vector<16x1xf32>
    %124 = arith.addf %122, %123 : vector<16x1xf32>
    %125 = math.rsqrt %124 : vector<16x1xf32>
    %c0_59 = arith.constant 0 : index
    %c0_60 = arith.constant 0 : index
    %126 = vector.load %arg8[%c0_59, %c0_60] : memref<16x1xf32, #tpu.memory_space<vmem>>, vector<16x1xf32>
    %127 = arith.mulf %125, %126 : vector<16x1xf32>
    %128 = vector.broadcast %116 : vector<16x1xf32> to vector<16x128xf32>
    %129 = arith.subf %109, %128 : vector<16x128xf32>
    %130 = vector.broadcast %127 : vector<16x1xf32> to vector<16x128xf32>
    %131 = arith.mulf %129, %130 : vector<16x128xf32>
    %c0_61 = arith.constant 0 : index
    %c0_62 = arith.constant 0 : index
    %132 = vector.load %arg9[%c0_61, %c0_62] : memref<16x1xf32, #tpu.memory_space<vmem>>, vector<16x1xf32>
    %133 = vector.broadcast %132 : vector<16x1xf32> to vector<16x128xf32>
    %134 = arith.addf %131, %133 : vector<16x128xf32>
    %c0_63 = arith.constant 0 : index
    %c0_64 = arith.constant 0 : index
    %135 = vector.load %arg0[%c0_63, %c0_64] : memref<16x128xf32, #tpu.memory_space<vmem>>, vector<16x128xf32>
    %136 = arith.addf %134, %135 : vector<16x128xf32>
    %cst_65 = arith.constant 0.000000e+00 : f32
    %137 = vector.broadcast %cst_65 : f32 to vector<16x128xf32>
    %138 = arith.maximumf %136, %137 : vector<16x128xf32>
    %c0_66 = arith.constant 0 : index
    %c0_67 = arith.constant 0 : index
    %139 = vector.load %arg11[%c0_66, %c0_67] : memref<16x128xf32, #tpu.memory_space<vmem>>, vector<16x128xf32>
    tpu.vector_store %arg11[%c0_66, %c0_67], %138 {strides = array<i32>} : memref<16x128xf32, #tpu.memory_space<vmem>>, vector<16x128xf32>,
    return
  }
}

</mosaic_0001>

<bundles_post_ra>
// kernel: bottleneck_forward.1
= control target key start
LH: loop header
LB: loop body
LE: loop exit
PB: predicated region body
PF: predicated region fallthrough
CT: control target
= control target key end

     0   :  { %v586_v0 = vmov 0.0   ;;  %vm587_vm0 = vmmov 0   ;;  %vm43_vm1 = vcmask 130048   ;;  %v588_v7 = vmov 0   ;;  %s589_s25 = smov 121   ;;  %s590_s26 = smov 120   ;;  %s753_s0 = inlined_call_operand.vmem [shape: f32[16,128], index: 0, kind: input, shape index: {}]   ;;  %s754_s1 = inlined_call_operand.vmem [shape: f32[8,16], index: 1, kind: input, shape index: {}]   ;;  %s755_s2 = inlined_call_operand.vmem [shape: f32[8,1], index: 2, kind: input, shape index: {}]   ;;  %s756_s3 = inlined_call_operand.vmem [shape: f32[8,1], index: 3, kind: input, shape index: {}]   ;;  %s757_s10 = inlined_call_operand.vmem [shape: f32[9,1,128], index: 10, kind: input, shape index: {}]   ;;  %s758_s4 = inlined_call_operand.vmem [shape: f32[8,72], index: 4, kind: input, shape index: {}]   ;;  %s759_s6 = inlined_call_operand.vmem [shape: f32[8,1], index: 6, kind: input, shape index: {}]   ;;  %s760_s5 = inlined_call_operand.vmem [shape: f32[8,1], index: 5, kind: input, shape index: {}]   ;;  %s761_s7 = inlined_call_operand.vmem [shape: f32[16,8], index: 7, kind: input, shape index: {}]   ;;  %s762_s9 = inlined_call_operand.vmem [shape: f32[16,1], index: 9, kind: input, shape index: {}]   ;;  %s763_s8 = inlined_call_operand.vmem [shape: f32[16,1], index: 8, kind: input, shape index: {}]   ;;  %s764_s11 = inlined_call_operand.vmem [shape: f32[16,128], index: 11, kind: output, shape index: {}]  }
   0x1   :  { %532 = vmatprep.subr.mxu0 %v586_v0  ;;  %v661_v1 = vld [vmem:[%s753_s0 + $0x8] sm:$0xff]  ;;  %v666_v2 = vld [vmem:[%s753_s0] sm:$0xff]  ;;  %536 = vmatprep.mubr.msk.f32.mxu0 %vm587_vm0, %v586_v0  ;;  %s591_s27 = smov 122   ;;  %s593_s28 = smov 127   ;;  %vm241_vm2 = vcmask 588800   ;;  %vm347_vm3 = vcmask 64512  }
   0x2   :  { %533 = vmatpush3.msra.mxu0 %v661_v1  ;;  %v40_v3 = vld [vmem:[%s754_s1] sm:$0xff]  ;;  %539 = vmatprep.subr.mxu1 %v586_v0  ;;  %s594_s29 = smov 1   ;;  %s596_s30 = smov 7   ;;  %v512_v26 = vld [vmem:[%s757_s10 + $0x8] ss:$0 sm:$0xff] }
   0x3   :  { %534 = vmatprep.subr.mxu0 %v586_v0  ;;  %557 = vmatprep.mubr.msk.f32.mxu1 %vm587_vm0, %v586_v0  ;;  %v129_v16 = vld [vmem:[%s755_s2] sm:$0xff]  ;;  %s592_s2 = smov 8  }
   0x4   :  { %535 = vmatpush3.msra.mxu0 %v666_v2  ;;  %576 = vset.pattern.permute.xlu1 %v588_v7  ;;  %v138_v19 = vld [vmem:[%s756_s3] sm:$0xff]  ;;  %s595_s3 = smov 6  }
   0x5   :  { %537 = vmatmul.mubr.msk.f32.vlgmr.msra.gmra.mxu0 %vm43_vm1, %v40_v3  ;;  %577 = vset.pattern.permute.xlu0 %v588_v7  ;;  %v510_v27 = vld [vmem:[%s757_s10 + $0x7] ss:$0 sm:$0xff]  ;;  %v508_v31 = vld [vmem:[%s757_s10 + $0x6] ss:$0 sm:$0xff]  ;;  %v506_v35 = vld [vmem:[%s757_s10 + $0x5] ss:$0 sm:$0xff] }
   0x6   :  { %v504_v37 = vld [vmem:[%s757_s10 + $0x4] ss:$0 sm:$0xff]  ;;  %v503_v39 = vld [vmem:[%s757_s10 + $0x3] ss:$0 sm:$0xff]  ;;  %v501_v43 = vld [vmem:[%s757_s10 + $0x2] ss:$0 sm:$0xff] }
   0x7   :  { %v499_v46 = vld [vmem:[%s757_s10 + $0x1] ss:$0 sm:$0xff]  ;;  %v497_v47 = vld [vmem:[%s757_s10] ss:$0 sm:$0xff] }
   0x8   :  { %v240_v52 = vld [vmem:[%s758_s4] sm:$0xff] }
   0x9   :  { %v336_v56 = vld [vmem:[%s759_s6] sm:$0xff] }
   0xa   :  { %v327_v3 = vld [vmem:[%s760_s5] sm:$0xff] }
  0xc5   :  { %v113_v4 = vpop.f32.mrf.mxu0 }
  0xc6   :  { %117 = vadd.xlane.f32.xlu0 %v113_v4  ;;  %v119_v6 = vmul.f32 %v113_v4, %v113_v4 }
  0xc7   :  { %v538_v5 = vpop.f32.mrf.mxu0 }
  0xca   :  { %120 = vadd.xlane.f32.xlu0 %v119_v6  ;;  %v345_v6 = vld [vmem:[%s761_s7] sm:$0xff] }
  0xcb   :  { %562 = vmatprep.mubr.msk.f32.mxu0 %vm347_vm3, %v345_v6 }
 0x14f   :  { %v118_v8 = vpop.xlane.xlu0 %117 }
 0x150   :  { %v122_v9 = vmul.f32 0.010204081, %v118_v8 }
 0x152   :  { %v124_v11 = vmul.f32 %v122_v9, %v122_v9  ;;  %v131_v21 = vsub.f32 %v113_v4, %v122_v9 }
 0x153   :  { %v121_v10 = vpop.xlane.xlu0 %120 }
 0x154   :  { %v123_v12 = vmul.f32 0.010204081, %v121_v10 }
 0x156   :  { %v125_v13 = vsub.f32 %v123_v12, %v124_v11 }
 0x158   :  { %v126_v14 = vmax.f32 %v125_v13, 0.0 }
 0x15a   :  { %v127_v15 = vadd.f32 1e-05, %v126_v14  ;;  %v346_v14 = vld [vmem:[%s761_s7 + $0x8] sm:$0xff] }
 0x15c   :  { %578 = vrsqrt.f32 %v127_v15 }
 0x169   :  { %v579_v17 = vpop.eup %578 }
 0x16a   :  { %v130_v18 = vmul.f32 %v579_v17, %v129_v16 }
 0x16c   :  { %134 = vperm.xlu1 %576, %v130_v18  }
 0x170   :  { %141 = vperm.xlu1 %576, %v138_v19   ;;  %v471_v19 = vld [vmem:[%s762_s9] sm:$0xff] }
 0x1e7   :  { %v135_v20 = vpop.permute.xlu1 %134 }
 0x1e8   :  { %v137_v22 = vmul.f32 %v135_v20, %v131_v21 }
 0x1eb   :  { %v142_v23 = vpop.permute.xlu1 %141 }
 0x1ec   :  { %v144_v24 = vadd.f32 %v142_v23, %v137_v22 }
 0x1ee   :  { %v145_v25 = vmax.f32 %v144_v24, 0.0 }
 0x1f0   :  { %218 = vrot.lane.b32.xlu1 %v145_v25, %s589_s25  ;;  %229 = vrot.lane.b32.xlu0 %v145_v25, %s590_s26  ;;  %v195_v40 = vmul.f32 %v504_v37, %v145_v25 }
 0x1f4   :  { %207 = vrot.lane.b32.xlu1 %v145_v25, %s591_s27  ;;  %146 = vrot.lane.b32.xlu0 %v145_v25, %s592_s2 }
 0x1f8   :  { %196 = vrot.lane.b32.xlu1 %v145_v25, %s593_s28 }
 0x1fc   :  { %178 = vrot.lane.b32.xlu1 %v145_v25, %s594_s29 }
 0x200   :  { %167 = vrot.lane.b32.xlu1 %v145_v25, %s595_s3 }
 0x204   :  { %156 = vrot.lane.b32.xlu1 %v145_v25, %s596_s30 }
 0x262   :  { %v219_v28 = vpop.permute.xlu1 %218  ;;  %v230_v29 = vpop.permute.xlu0 %229 }
 0x263   :  { %v239_v30 = vmul.f32 %v512_v26, %v230_v29  ;;  %v228_v32 = vmul.f32 %v510_v27, %v219_v28 }
 0x265   :  { %540 = vmatpush3.msra.mxu1 %v239_v30 }
 0x266   :  { %v208_v33 = vpop.permute.xlu1 %207  ;;  %541 = vmatprep.subr.mxu1 %v586_v0  ;;  %v147_v48 = vpop.permute.xlu0 %146 }
 0x267   :  { %v217_v34 = vmul.f32 %v508_v31, %v208_v33  ;;  %542 = vmatpush3.msra.mxu1 %v228_v32  ;;  %v155_v51 = vmul.f32 %v497_v47, %v147_v48 }
 0x268   :  { %543 = vmatprep.subr.mxu1 %v586_v0 }
 0x269   :  { %544 = vmatpush3.msra.mxu1 %v217_v34 }
 0x26a   :  { %v197_v36 = vpop.permute.xlu1 %196  ;;  %545 = vmatprep.subr.mxu1 %v586_v0 }
 0x26b   :  { %v206_v38 = vmul.f32 %v506_v35, %v197_v36  ;;  %v453_v36 = vld [vmem:[%s763_s8] sm:$0xff] }
 0x26d   :  { %546 = vmatpush3.msra.mxu1 %v206_v38 }
 0x26e   :  { %v179_v41 = vpop.permute.xlu1 %178  ;;  %547 = vmatprep.subr.mxu1 %v586_v0 }
 0x26f   :  { %v188_v42 = vmul.f32 %v503_v39, %v179_v41  ;;  %548 = vmatpush3.msra.mxu1 %v195_v40  ;;  %v454_v39 = vld [vmem:[%s763_s8 + $0x8] sm:$0xff] }
 0x270   :  { %549 = vmatprep.subr.mxu1 %v586_v0  ;;  %v472_v41 = vld [vmem:[%s762_s9 + $0x8] sm:$0xff] }
 0x271   :  { %550 = vmatpush3.msra.mxu1 %v188_v42 }
 0x272   :  { %v168_v44 = vpop.permute.xlu1 %167  ;;  %551 = vmatprep.subr.mxu1 %v586_v0 }
 0x273   :  { %v177_v45 = vmul.f32 %v501_v43, %v168_v44 }
 0x275   :  { %552 = vmatpush3.msra.mxu1 %v177_v45 }
 0x276   :  { %v157_v49 = vpop.permute.xlu1 %156  ;;  %553 = vmatprep.subr.mxu1 %v586_v0 }
 0x277   :  { %v166_v50 = vmul.f32 %v499_v46, %v157_v49 }
 0x279   :  { %554 = vmatpush3.msra.mxu1 %v166_v50 }
 0x27a   :  { %555 = vmatprep.subr.mxu1 %v586_v0 }
 0x27b   :  { %556 = vmatpush3.msra.mxu1 %v155_v51 }
 0x27c   :  { %558 = vmatmul.mubr.msk.f32.vlgmr.msra.gmra.mxu1 %vm241_vm2, %v240_v52 }
 0x33c   :  { %v311_v53 = vpop.f32.mrf.mxu1 }
 0x33d   :  { %315 = vadd.xlane.f32.xlu1 %v311_v53  ;;  %v317_v54 = vmul.f32 %v311_v53, %v311_v53 }
 0x33e   :  { %v559_v55 = vpop.f32.mrf.mxu1 }
 0x33f   :  { %318 = vadd.xlane.f32.xlu0 %v317_v54 }
 0x34e   :  { %339 = vperm.xlu1 %576, %v336_v56  }
 0x3c6   :  { %v316_v57 = vpop.xlane.xlu1 %315 }
 0x3c7   :  { %v320_v58 = vmul.f32 0.010204081, %v316_v57 }
 0x3c8   :  { %v319_v59 = vpop.xlane.xlu0 %318 }
 0x3c9   :  { %v322_v60 = vmul.f32 %v320_v58, %v320_v58  ;;  %v321_v61 = vmul.f32 0.010204081, %v319_v59  ;;  %v329_v7 = vsub.f32 %v311_v53, %v320_v58 }
 0x3ca   :  { %v340_v10 = vpop.permute.xlu1 %339 }
 0x3cb   :  { %v323_v62 = vsub.f32 %v321_v61, %v322_v60 }
 0x3cd   :  { %v324_v63 = vmax.f32 %v323_v62, 0.0 }
 0x3cf   :  { %v325_v0 = vadd.f32 1e-05, %v324_v63 }
 0x3d1   :  { %580 = vrsqrt.f32 %v325_v0 }
 0x3de   :  { %v581_v4 = vpop.eup %580 }
 0x3df   :  { %v328_v5 = vmul.f32 %v581_v4, %v327_v3 }
 0x3e1   :  { %332 = vperm.xlu0 %577, %v328_v5  }
 0x45c   :  { %v333_v8 = vpop.permute.xlu0 %332 }
 0x45d   :  { %v335_v9 = vmul.f32 %v333_v8, %v329_v7 }
 0x45f   :  { %v342_v11 = vadd.f32 %v340_v10, %v335_v9 }
 0x461   :  { %v343_v12 = vmax.f32 %v342_v11, 0.0 }
 0x463   :  { %v344_v13 = vmul.f32 %v504_v37, %v343_v12 }
 0x465   :  { %560 = vmatprep.subr.mxu0 %v344_v13 }
 0x466   :  { %561 = vmatpush3.msra.mxu0 %v344_v13 }
 0x467   :  { %563 = vmatmul.mubr.msk.f32.vlgmr.msra.gmra.mxu0 %vm347_vm3, %v346_v14 }
 0x527   :  { %v564_v15 = vpop.f32.mrf.mxu0 }
 0x528   :  { %431 = vadd.xlane.f32.xlu0 %v564_v15  ;;  %v434_v18 = vmul.f32 %v564_v15, %v564_v15 }
 0x529   :  { %v420_v16 = vpop.f32.mrf.mxu0 }
 0x52a   :  { %429 = vadd.xlane.f32.xlu1 %v420_v16  ;;  %v433_v17 = vmul.f32 %v420_v16, %v420_v16 }
 0x52e   :  { %435 = vadd.xlane.f32.xlu1 %v433_v17 }
 0x532   :  { %437 = vadd.xlane.f32.xlu1 %v434_v18 }
 0x543   :  { %475 = vperm.xlu1 %576, %v471_v19  }
 0x5b1   :  { %v432_v22 = vpop.xlane.xlu0 %431 }
 0x5b2   :  { %v440_v24 = vmul.f32 0.010204081, %v432_v22 }
 0x5b3   :  { %v430_v20 = vpop.xlane.xlu1 %429 }
 0x5b4   :  { %v439_v21 = vmul.f32 0.010204081, %v430_v20  ;;  %v444_v29 = vmul.f32 %v440_v24, %v440_v24  ;;  %v458_v48 = vsub.f32 %v564_v15, %v440_v24 }
 0x5b6   :  { %v443_v25 = vmul.f32 %v439_v21, %v439_v21  ;;  %v457_v44 = vsub.f32 %v420_v16, %v439_v21 }
 0x5b7   :  { %v436_v23 = vpop.xlane.xlu1 %435 }
 0x5b8   :  { %v441_v26 = vmul.f32 0.010204081, %v436_v23 }
 0x5ba   :  { %v445_v27 = vsub.f32 %v441_v26, %v443_v25 }
 0x5bb   :  { %v438_v28 = vpop.xlane.xlu1 %437 }
 0x5bc   :  { %v447_v30 = vmax.f32 %v445_v27, 0.0  ;;  %v442_v31 = vmul.f32 0.010204081, %v438_v28 }
 0x5be   :  { %v449_v32 = vadd.f32 1e-05, %v447_v30  ;;  %v446_v33 = vsub.f32 %v442_v31, %v444_v29 }
 0x5bf   :  { %v476_v43 = vpop.permute.xlu1 %475 }
 0x5c0   :  { %582 = vrsqrt.f32 %v449_v32  ;;  %v448_v34 = vmax.f32 %v446_v33, 0.0 }
 0x5c2   :  { %v450_v35 = vadd.f32 1e-05, %v448_v34 }
 0x5c4   :  { %584 = vrsqrt.f32 %v450_v35 }
 0x5cd   :  { %v583_v37 = vpop.eup %582 }
 0x5ce   :  { %v455_v38 = vmul.f32 %v583_v37, %v453_v36 }
 0x5d0   :  { %461 = vperm.xlu1 %576, %v455_v38  }
 0x5d1   :  { %v585_v40 = vpop.eup %584 }
 0x5d2   :  { %v456_v42 = vmul.f32 %v585_v40, %v454_v39 }
 0x5d4   :  { %480 = vperm.xlu1 %576, %v472_v41   ;;  %466 = vperm.xlu0 %577, %v456_v42  }
 0x64b   :  { %v462_v45 = vpop.permute.xlu1 %461 }
 0x64c   :  { %v469_v46 = vmul.f32 %v462_v45, %v457_v44 }
 0x64e   :  { %v483_v47 = vadd.f32 %v476_v43, %v469_v46 }
 0x64f   :  { %v467_v49 = vpop.permute.xlu0 %466  ;;  %v481_v52 = vpop.permute.xlu1 %480 }
 0x650   :  { %v485_v50 = vadd.f32 %v483_v47, %v666_v2  ;;  %v470_v51 = vmul.f32 %v467_v49, %v458_v48 }
 0x652   :  { %v487_v53 = vmax.f32 %v485_v50, 0.0  ;;  %v484_v54 = vadd.f32 %v481_v52, %v470_v51 }
 0x654   :  { %489 = vst [vmem:[%s764_s11] sm:$0xff] %v487_v53  ;;  %v486_v55 = vadd.f32 %v484_v54, %v661_v1 }
 0x656   :  { %v488_v56 = vmax.f32 %v486_v55, 0.0 }
 0x658   :  { %490 = vst [vmem:[%s764_s11 + $0x8] sm:$0xff] %v488_v56 }

</bundles_post_ra>
